<compile_context>
chip_gen: v7x
topology: tpu7x:2x2x1
jax: 0.10.0
libtpu: 0.0.40
codegen_flags: <defaults>
</compile_context>

<pallas_src>
import functools

import jax
import jax.numpy as jnp
from jax.experimental import pallas as pl
from jax.experimental.pallas import tpu as pltpu


def _round_up(x, m):
    return (x + m - 1) // m * m


def _cdiv(a, b):
    return -(-a // b)


# ---------------------------------------------------------------------------
# Kernels
# ---------------------------------------------------------------------------
def _linact_kernel_single_k(x_ref, w_ref, b_ref, o_ref):
    # Whole reduction in one step: no f32 accumulator round-trips through VMEM.
    x = x_ref[...].astype(w_ref.dtype)          # no-op when x is already bf16
    acc = jnp.dot(x, w_ref[...], preferred_element_type=jnp.float32)
    o_ref[...] = jnp.maximum(acc + b_ref[...], 0.0).astype(o_ref.dtype)


def _linact_kernel_multi_k(x_ref, w_ref, b_ref, o_ref, acc_ref):
    k = pl.program_id(2)
    x = x_ref[...].astype(w_ref.dtype)
    prod = jnp.dot(x, w_ref[...], preferred_element_type=jnp.float32)

    @pl.when(k == 0)
    def _():
        acc_ref[...] = prod             # overwrite: saves a zero-init VMEM pass

    @pl.when(k > 0)
    def _():
        acc_ref[...] += prod

    @pl.when(k == pl.num_programs(2) - 1)
    def _():
        out = jnp.maximum(acc_ref[...] + b_ref[...], 0.0)   # bias + ReLU in f32
        o_ref[...] = out.astype(o_ref.dtype)


# ---------------------------------------------------------------------------
# Generation-dependent tile defaults
#   (tm0, tn0, tk0, vmem_budget_bytes, default_scoped_bytes, tensorcores)
# ---------------------------------------------------------------------------
_GEN_TILES = {
    "v5e": (512, 512, 512, 96 << 20, 16 << 20, 1),
    "v6e": (2048, 1024, 512, 96 << 20, 32 << 20, 1),
    "v7x": (1024, 512, 512, 44 << 20, 32 << 20, 2),
    None:  (1024, 512, 512, 44 << 20, 32 << 20, 2),   # unknown: conservative
}


def _tpu_generation():
    try:
        kind = jax.devices()[0].device_kind.lower()
    except Exception:
        return None
    if "v5 lite" in kind or "v5e" in kind or "v5lite" in kind:
        return "v5e"
    if "v6" in kind:
        return "v6e"
    if "v7" in kind:
        return "v7x"
    return None


# ---------------------------------------------------------------------------
# Wrapper
# ---------------------------------------------------------------------------
@functools.partial(
    jax.jit,
    static_argnames=("do_prob", "compute_dtype", "tile_m", "tile_n", "tile_k"))
def linact(x, w, b, *, do_prob=0.0, compute_dtype=jnp.bfloat16,
           tile_m=None, tile_n=None, tile_k=None):
    """LinAct forward: relu(x @ w + b); dropout(p=do_prob) at inference == id.

    x: [..., n_in]
    w: [n_in, n_out]   (transpose of PyTorch's nn.Linear weight)
    b: [n_out]
    """
    del do_prob  # inference-mode dropout is the identity (see TODO at top)

    orig_shape = x.shape
    n_in = orig_shape[-1]
    n_out = w.shape[1]
    out_dtype = x.dtype

    x2d = x.reshape(-1, n_in)
    m = x2d.shape[0]

    gen = _tpu_generation()
    tm0, tn0, tk0, vmem_budget, default_scoped, n_cores = _GEN_TILES[gen]
    if tile_m is not None:
        tm0 = tile_m
    if tile_n is not None:
        tn0 = tile_n
    if tile_k is not None:
        tk0 = tile_k

    # ---- N tile: lane-dense, never downgraded below the generation default.
    # Last tile may be partial (masked store) -> no wrapper-side N padding of
    # W/b and no post-kernel output slice.
    if n_out <= tn0:
        tn = n_out                      # full-extent block (always legal)
    else:
        tn = tn0                        # multiple of 128 by construction
    grid_n = _cdiv(n_out, tn)

    # ---- K tile: balanced chunks, zero-padded only when K is actually split.
    if n_in <= tk0:
        tk, k_p = n_in, n_in
    else:
        n_chunks = _cdiv(n_in, tk0)
        tk = _round_up(_cdiv(n_in, n_chunks), 128)
        k_p = tk * n_chunks
    grid_k = k_p // tk
    single_k = grid_k == 1
    need_k_pad = k_p != n_in

    # ---- x / w / b staging ---------------------------------------------------
    w_c = w.astype(compute_dtype)
    b_c = b.astype(jnp.float32).reshape(1, n_out)
    if need_k_pad:
        # K must be zero-padded for correctness; cast x in the same pass.
        x_c = jnp.pad(x2d.astype(compute_dtype), ((0, 0), (0, k_p - n_in)))
        w_c = jnp.pad(w_c, ((0, k_p - n_in), (0, 0)))
    elif grid_n > 2 and x2d.dtype != jnp.dtype(compute_dtype):
        # x is streamed grid_n times; a single up-front cast pass is cheaper.
        x_c = x2d.astype(compute_dtype)
    else:
        # Stream x as-is and cast each tile inside the kernel: avoids an extra
        # full read+write HBM pass over x when it is re-read <= 2 times.
        x_c = x2d

    # ---- M tile: generation default, shrunk to fit the VMEM budget -----------
    tm = m if m <= tm0 else tm0
    x_item = x_c.dtype.itemsize
    w_item = w_c.dtype.itemsize
    out_item = jnp.dtype(out_dtype).itemsize

    def vmem_estimate(tm_):
        bufs = 2 * (tm_ * tk * x_item + tk * tn * w_item + tn * 4
                    + tm_ * tn * out_item)          # double-buffered in/out
        if not single_k:
            bufs += tm_ * tn * 4                    # f32 accumulator scratch
        return bufs

    while vmem_estimate(tm) > vmem_budget and tm > 512:
        tm = max(512, _round_up(tm // 2, 8))
    grid_m = _cdiv(m, tm)

    # v7x: make sure both TensorCores get at least one parallel grid step.
    if n_cores > 1 and grid_m * grid_n < n_cores and m >= 16:
        tm = _round_up(_cdiv(m, n_cores), 8)
        grid_m = _cdiv(m, tm)

    vmem_limit = int(min(vmem_budget,
                         max(default_scoped,
                             vmem_estimate(tm) * 5 // 4 + (8 << 20))))

    cost = pl.CostEstimate(
        flops=2 * m * n_in * n_out,
        transcendentals=0,
        bytes_accessed=(x_c.size * x_item * grid_n        # x re-read per N tile
                        + w_c.size * w_item * grid_m      # W re-read per M tile
                        + b_c.size * 4
                        + m * n_out * out_item),
    )

    if single_k:
        compiler_params = pltpu.CompilerParams(
            dimension_semantics=("parallel", "parallel"),
            vmem_limit_bytes=vmem_limit,
        )
        out = pl.pallas_call(
            _linact_kernel_single_k,
            out_shape=jax.ShapeDtypeStruct((m, n_out), out_dtype),
            grid_spec=pltpu.PrefetchScalarGridSpec(
                num_scalar_prefetch=0,
                grid=(grid_m, grid_n),
                in_specs=[
                    pl.BlockSpec((tm, tk), lambda i, j: (i, 0)),
                    pl.BlockSpec((tk, tn), lambda i, j: (0, j)),
                    pl.BlockSpec((1, tn), lambda i, j: (0, j)),
                ],
                out_specs=pl.BlockSpec((tm, tn), lambda i, j: (i, j)),
            ),
            compiler_params=compiler_params,
            cost_estimate=cost,
        )(x_c, w_c, b_c)
    else:
        compiler_params = pltpu.CompilerParams(
            dimension_semantics=("parallel", "parallel", "arbitrary"),
            vmem_limit_bytes=vmem_limit,
        )
        out = pl.pallas_call(
            _linact_kernel_multi_k,
            out_shape=jax.ShapeDtypeStruct((m, n_out), out_dtype),
            grid_spec=pltpu.PrefetchScalarGridSpec(
                num_scalar_prefetch=0,
                grid=(grid_m, grid_n, grid_k),
                in_specs=[
                    pl.BlockSpec((tm, tk), lambda i, j, k: (i, k)),
                    pl.BlockSpec((tk, tn), lambda i, j, k: (k, j)),
                    pl.BlockSpec((1, tn), lambda i, j, k: (0, j)),
                ],
                out_specs=pl.BlockSpec((tm, tn), lambda i, j, k: (i, j)),
                scratch_shapes=[pltpu.VMEM((tm, tn), jnp.float32)],
            ),
            compiler_params=compiler_params,
            cost_estimate=cost,
        )(x_c, w_c, b_c)

    return out.reshape(*orig_shape[:-1], n_out)


def init_linact_params(key, n_in, n_out):
    """Deterministic nn.Linear-style init: U(-1/sqrt(n_in), 1/sqrt(n_in))."""
    kw, kb = jax.random.split(key)
    bound = 1.0 / (n_in ** 0.5)
    # PyTorch stores weight as (n_out, n_in); we keep the transposed (n_in, n_out).
    w = jax.random.uniform(kw, (n_in, n_out), jnp.float32, -bound, bound)
    b = jax.random.uniform(kb, (n_out,), jnp.float32, -bound, bound)
    return w, b


def _bf16_reference(x, w, b):
    """relu(x @ w + b) with the same bf16-input / f32-accumulate contraction."""
    n_in, n_out = w.shape
    y = jnp.dot(x.reshape(-1, n_in).astype(jnp.bfloat16),
                w.astype(jnp.bfloat16),
                preferred_element_type=jnp.float32)
    y = y.reshape(*x.shape[:-1], n_out) + b
    return jnp.maximum(y, 0.0)


if __name__ == "__main__":
    key = jax.random.PRNGKey(0)
    k_x1, k_p1, k_x2, k_p2 = jax.random.split(key, 4)

    # ---- Test 1: default path (single-K fast path, full-extent N tile) ------
    batch, seq, n_in, n_out = 2, 8, 32, 64
    x1 = jax.random.normal(k_x1, (batch, seq, n_in), jnp.float32)
    w1, b1 = init_linact_params(k_p1, n_in, n_out)

    out1 = linact(x1, w1, b1)
    jax.block_until_ready(out1)
    assert out1.shape == (batch, seq, n_out)
    assert jnp.allclose(out1, _bf16_reference(x1, w1, b1), atol=1e-2, rtol=1e-2)
    assert jnp.allclose(out1, jnp.maximum(x1 @ w1 + b1, 0.0),
                        atol=5e-2, rtol=5e-2)

    # ---- Test 2: multi-K accumulator path with K padding, M tail tile and a
    #      partial (masked) last N tile, via small tile overrides. ------------
    b2_, s2_, n_in2, n_out2 = 5, 32, 300, 200
    x2 = jax.random.normal(k_x2, (b2_, s2_, n_in2), jnp.float32)
    w2, b2 = init_linact_params(k_p2, n_in2, n_out2)

    out2 = linact(x2, w2, b2, tile_m=64, tile_n=128, tile_k=128)
    jax.block_until_ready(out2)
    assert out2.shape == (b2_, s2_, n_out2)
    assert jnp.allclose(out2, _bf16_reference(x2, w2, b2), atol=1e-2, rtol=1e-2)
    assert jnp.allclose(out2, jnp.maximum(x2 @ w2 + b2, 0.0),
                        atol=5e-2, rtol=5e-2)

    print("KERNEL_OK")
</pallas_src>

<mosaic_0001>
module attributes {stable_mosaic.version = 11 : i64} {
  func.func @_linact_kernel_single_k(%arg0: i32, %arg1: i32, %arg2: memref<8x32xf32, #tpu.memory_space<vmem>>, %arg3: memref<32x64xbf16, #tpu.memory_space<vmem>>, %arg4: memref<1x64xf32, #tpu.memory_space<vmem>>, %arg5: memref<8x64xf32, #tpu.memory_space<vmem>>) attributes {dimension_semantics = [#tpu.dimension_semantics<parallel>, #tpu.dimension_semantics<parallel>], iteration_bounds = array<i64: 2, 1>, scalar_prefetch = 0 : i64, scratch_operands = 0 : i64, tpu.core_type = #tpu.core_type<tc>, window_params = [{transform_indices = @transform_0, window_bounds = array<i64: 8, 32>}, {transform_indices = @transform_1, window_bounds = array<i64: 32, 64>}, {transform_indices = @transform_2, window_bounds = array<i64: 1, 64>}, {transform_indices = @transform_3, window_bounds = array<i64: 8, 64>}]} {
    %c0 = arith.constant 0 : index
    %c0_0 = arith.constant 0 : index
    %0 = vector.load %arg2[%c0, %c0_0] : memref<8x32xf32, #tpu.memory_space<vmem>>, vector<8x32xf32>
    %1 = arith.truncf %0 : vector<8x32xf32> to vector<8x32xbf16>
    %c0_1 = arith.constant 0 : index
    %c0_2 = arith.constant 0 : index
    %2 = vector.load %arg3[%c0_1, %c0_2] : memref<32x64xbf16, #tpu.memory_space<vmem>>, vector<32x64xbf16>
    %cst = arith.constant dense<0.000000e+00> : vector<8x64xf32>
    %3 = tpu.matmul %1, %2, %cst {dimension_numbers = #tpu.dot_dimension_numbers<[1], [0], [0], [1], [0, 0, 1, 1], [], []>} : vector<8x32xbf16>, vector<32x64xbf16>, vector<8x64xf32> -> vector<8x64xf32>
    %c0_3 = arith.constant 0 : index
    %c0_4 = arith.constant 0 : index
    %4 = vector.load %arg4[%c0_3, %c0_4] : memref<1x64xf32, #tpu.memory_space<vmem>>, vector<1x64xf32>
    %5 = vector.broadcast %4 : vector<1x64xf32> to vector<8x64xf32>
    %6 = arith.addf %3, %5 : vector<8x64xf32>
    %cst_5 = arith.constant 0.000000e+00 : f32
    %7 = vector.broadcast %cst_5 : f32 to vector<8x64xf32>
    %8 = arith.maximumf %6, %7 : vector<8x64xf32>
    %c0_6 = arith.constant 0 : index
    %c0_7 = arith.constant 0 : index
    %9 = vector.load %arg5[%c0_6, %c0_7] : memref<8x64xf32, #tpu.memory_space<vmem>>, vector<8x64xf32>
    tpu.vector_store %arg5[%c0_6, %c0_7], %8 {strides = array<i32>} : memref<8x64xf32, #tpu.memory_space<vmem>>, vector<8x64xf32>,
    return
  }
  func.func @transform_0(%arg0: i32, %arg1: i32) -> (i32, i32) {
    %c0_i32 = arith.constant 0 : i32
    %c0_i32_0 = arith.constant 0 : i32
    return %arg0, %c0_i32 : i32, i32
  }
  func.func @transform_1(%arg0: i32, %arg1: i32) -> (i32, i32) {
    %c0_i32 = arith.constant 0 : i32
    %c0_i32_0 = arith.constant 0 : i32
    return %c0_i32, %arg1 : i32, i32
  }
  func.func @transform_2(%arg0: i32, %arg1: i32) -> (i32, i32) {
    %c0_i32 = arith.constant 0 : i32
    %c0_i32_0 = arith.constant 0 : i32
    return %c0_i32, %arg1 : i32, i32
  }
  func.func @transform_3(%arg0: i32, %arg1: i32) -> (i32, i32) {
    %c0_i32 = arith.constant 0 : i32
    return %arg0, %arg1 : i32, i32
  }
}

</mosaic_0001>

<bundles_post_ra>
// kernel: linact.1
= control target key start
LH: loop header
LB: loop body
LE: loop exit
PB: predicated region body
PF: predicated region fallthrough
CT: control target
= control target key end

     0   :  { %8 = vsyncpa [#allocation3], 0  ;;  %s705_s0 = inlined_call_operand.vmem [shape: f32[16,32], index: 0, kind: input, shape index: {}]   ;;  %s706_s1 = inlined_call_operand.vmem [shape: bf16[32,64], index: 1, kind: input, shape index: {}]   ;;  %s707_s2 = inlined_call_operand.vmem [shape: f32[1,64], index: 2, kind: input, shape index: {}]   ;;  %s708_s3 = inlined_call_operand.hbm [shape: f32[16,64], index: 3, kind: output, shape index: {}]  }
   0x1   :  { %10 = vsyncpa [#allocation3 + $0x1], 0  ;;  %s584_s12 = smov 0   ;;  %s586_s13 = smov 0  }
   0x2   :  { %s588_s14 = smov 0   ;;  %s590_s15 = smov 0  }
   0x3   :  { %s592_s16 = smov 0   ;;  %s594_s17 = smov 0  }
   0x4 LB: > { %s394_s18 = sadd.s32 4294967295, %s559_s17   ;;  %s395_s19 = sadd.s32 4294967294, %s559_s17   ;;  %s559_s17 = sphi %s594_s17, %s16_s17   ;;  %s555_s16 = sphi %s592_s16, %s715_s16   ;;  %s551_s15 = sphi %s590_s15, %s714_s15   ;;  %s547_s14 = sphi %s588_s14, %s713_s14   ;;  %s543_s13 = sphi %s586_s13, %s712_s13   ;;  %s539_s12 = sphi %s584_s12, %s711_s12  }
   0x5   : > { %s28_s20 = sadd.s32 1, %s555_s16  ;;  %s115_s21 = sadd.s32 1, %s547_s14 }
   0x6   : > { %p30_p0 = scmp.ge.s32.totalorder %s28_s20, 2  ;;  %p125_p1 = scmp.ne.s32.totalorder %s547_s14, %s543_s13 }
   0x7   : > { %p126_p2 = scmp.eq.s32.totalorder %s394_s18, 1  ;;  %p131_p3 = scmp.ne.s32.totalorder %s543_s13, %s539_s12 }
   0x8   : > { %s717_s20 = smov (%p30_p0, %s28_s20), 0  ;;  %p132_p5 = scmp.eq.s32.totalorder %s395_s19, 1 }
   0x9   : > { %p624_p4 = por %p126_p2, %p125_p1  ;;  %s110_s23 = ssub.s32 %s555_s16, %s717_s20 }
   0xa   : > { %p400_p6 = scmp.ge.s32.totalorder %s559_s17, 1  ;;  %p113_p7 = scmp.eq.s32.totalorder %s110_s23, 0 }
   0xb   : > { %p631_p8 = por %p132_p5, %p131_p3  ;;  %p170_p9 = scmp.lt.s32.totalorder %s559_s17, 3 }
   0xc   : > { %s637_s25 = scalar_select %p113_p7, %s547_s14, %s115_s21  }
   0xd   : > { %p171_p10 = pnand %p400_p6, %p170_p9 }
   0xe   : > { %v479_v0 = vld [vmem:[%s706_s1] sm:$0xff] (!%p171_p10)   ;;  %v561_v1 = vmov (!%p171_p10), 0.0   ;;  %v480_v2 = vld [vmem:[%s706_s1 + $0x8] sm:$0xff] (!%p171_p10)   ;;  %vm562_vm0 = vmmov (!%p171_p10), 0   ;;  %p200_p11 = scmp.lt.s32.totalorder (!%p171_p10), %s551_s15, 1  ;;  %vm237_vm1 = vcmask (!%p171_p10), 261120  }
   0xf   : > { %174 = sbr.rel (%p171_p10) target bundleno = 259 (0x103), region = 32  ;;  %414 = vmatprep.subr.bf16.mxu0 (!%p171_p10), %v561_v1  ;;  %418 = vmatprep.mubr.msk.bf16.mxu0 (!%p171_p10), %vm562_vm0, %v561_v1  ;;  %s197_s8 = sand.u32 (!%p171_p10), 1, %s543_s13   ;;  %v403_v5 = vld [vmem:[%s707_s2] ss:$0 sm:$0xff] (!%p171_p10)  ;;  %vm282_vm2 = vcmask (!%p171_p10), 523264  }
  0x10   : > { %415 = vmatpush3.bf16.msra.mxu0 (!%p171_p10), %v479_v0  ;;  %s401_s9 = sshll.u32 (!%p171_p10), %s197_s8, 3  ;;  %s408_s18 = sshll.u32 (!%p171_p10), %s551_s15, 7 }
  0x11   : > { %416 = vmatprep.subr.bf16.mxu0 (!%p171_p10), %v561_v1  ;;  %s199_s19 = scalar_lea.vmem (!%p171_p10), [#allocation2], %s401_s9  ;;  %s658_s27 = scalar_lea.hbm (!%p171_p10), %s708_s3, %s408_s18 }
  0x12   : > { %s299_s21 = sshll.u32 (!%p171_p10), %s199_s19, 4  ;;  %s563_s29 = smov (!%p171_p10), [#allocation2]   ;;  %s660_s21 = int_to_ptr.vmem [resolvable:$true] %s299_s21 }
  0x13   : > { %s481_s28 = scalar_lea.vmem (!%p171_p10), %s660_s21, 128 }
  0x14   : > { %417 = vmatpush3.bf16.msra.mxu0 (!%p171_p10), %v480_v2  ;;  %p482_p12 = scmp.ne.s32.totalorder (!%p171_p10), %s660_s21, %s481_s28 }
  0x16   : > { %s201_s30 = scalar_select %p200_p11, %s551_s15, 1 }
  0x17   : > { %s285_s15 = scalar_lea.sflag [#allocation3], %s197_s8  ;;  %p483_p13 = pnand %p482_p12, %p624_p4 }
  0x18   : > { %s402_s4 = sshll.u32 %s201_s30, 3  ;;  %s485_s30 = sshll.u32 %s563_s29, 4  ;;  %s486_s30 = int_to_ptr.vmem [resolvable:$false] %s485_s30 }
  0x19   : > { %s203_s7 = scalar_lea.vmem %s705_s0, %s402_s4  ;;  %p484_p0 = pneg %p483_p13 }
  0x1a   : > { %v212_v3 = vld [vmem:[%s203_s7] sm:$0xff]  ;;  %s487_s4 = scalar_lea.vmem %s486_s30, 256  ;;  %p488_p1 = scmp.lt.s32.totalorder %s660_s21, %s486_s30 }
  0x1b   : > { %v213_v4 = vpack.c.bf16 %v212_v3, %v212_v3  ;;  %p489_p2 = scmp.lt.s32.totalorder %s487_s4, %s481_s28 }
  0x1d   : > { %419 = vmatmul.mubr.msk.bf16.vlgmr.msra.gmra.mrb[0].mxu0 %vm237_vm1, %v213_v4  ;;  %p490_p3 = por %p489_p2, %p488_p1 }
  0x1f   : > { %p491_p5 = pnand %p490_p3, %p484_p0 }
  0xf0   : > { %v275_v6 = vpop.f32.mrb[0].mxu0 }
  0xf1   : > { %v276_v7 = vadd.f32 %v403_v5, %v275_v6  ;;  %v420_v8 = vpop.f32.mrb[1].mxu0 }
  0xf2   : > { %v278_v9 = vpop.f32.mrb[2].mxu0 }
  0xf3   : > { %v281_v10 = vmax.f32 %v276_v7, 0.0  ;;  %v421_v11 = vpop.f32.mrb[3].mxu0 }
  0xf5   : > { %283 = vst.msk [vmem:[%s199_s19] sm:$0xff] %vm282_vm2, %v281_v10 }
  0xf6   : > { %494 = shalt.err (!%p491_p5)
}
  0xf7   : > { %s495_s5 = scalar_lea.hbm %s658_s27, 128  ;;  %s499_s8 = scalar_lea.hbm %s708_s3, 256 }
  0xf8   : > { %p496_p6 = scmp.ne.s32.totalorder %s658_s27, %s495_s5  ;;  %p500_p10 = scmp.lt.u32.totalorder %s658_s27, %s708_s3 }
  0xf9   : > { %p501_p11 = scmp.lt.u32.totalorder %s499_s8, %s495_s5  ;;  %p503_p13 = scmp.lt.u32.totalorder %s495_s5, %s658_s27 }
  0xfa   : > { %p497_p7 = pnand %p496_p6, %p624_p4 }
  0xfb   : > { %p502_p12 = por %p501_p11, %p500_p10 }
  0xfc   : > { %p498_p9 = pneg %p497_p7 }
  0xfd   : > { %p504_p0 = por %p503_p13, %p502_p12 }
  0xff   : > { %p505_p1 = pnand %p504_p0, %p498_p9 }
 0x101   : > { %508 = shalt.err (!%p505_p1)
}
 0x102   : > { %422 = dma.vmem_to_hbm [thread:$0]  (%p624_p4), %s660_s21, 128, %s658_s27, %s285_s15  }
 0x103 PF: > { %p428_p2 = scmp.ge.s32.totalorder %s559_s17, 2  ;;  %s311_s11 = sand.u32 1, %s539_s12  }
 0x104   : > { %s312_s18 = scalar_lea.sflag [#allocation3], %s311_s11 }
 0x105   : > { %p425_p3 = pnand %p428_p2, %p631_p8 }
 0x107   : > { %534 = dma.done.wait (!%p425_p3), %s312_s18, 128  }
 0x108   : > { %536 = vsyncadd (!%p425_p3), %s312_s18, 4294967168  ;;  %s16_s17 = sadd.s32 1, %s559_s17   ;;  %s711_s12 = smov %s543_s13 }
 0x109   : > { %p13_p5 = scmp.ge.s32.totalorder %s16_s17, 4   ;;  %s712_s13 = smov %s547_s14 }
 0x10a   : > { %s713_s14 = smov %s637_s25  ;;  %s714_s15 = smov %s555_s16 }
 0x10b   : > { %s715_s16 = smov %s717_s20  ;;  %15 = sbr.rel (!%p13_p5) target bundleno = 4 (0x4), region = 73 }
 0x112   :  { %317 = vsyncpa [#allocation3], 1 }
 0x113   :  { %319 = vsyncpa [#allocation3 + $0x1], 1 }

</bundles_post_ra>
